<compile_context>
chip_gen: v6e
topology: v6e:2x2x1
jax: 0.10.0
libtpu: 0.0.40
codegen_flags: <defaults>
</compile_context>

<pallas_src>
import functools
import math

import jax
import jax.numpy as jnp
from jax.experimental import pallas as pl
from jax.experimental.pallas import tpu as pltpu


def _a_scn_kernel(x_ref, wqv_ref, bqv_ref, wkt_ref, out_ref, att_ref,
                  k_scr, acc_scr, *, tq, c4):
    # x_ref:   (1, N, C)    resident for the whole batch
    # wqv_ref: (C, C4 + C)  bf16, [Wq^T*scale | Wv^T]
    # bqv_ref: (1, C4 + C)  f32,  [0 | bv]
    # wkt_ref: (C, C4)      bf16
    # out_ref: (1, N, C)    resident across the query-tile axis (accumulated)
    # att_ref: (1, TQ, N)   per-tile attention rows
    # k_scr:   (N, C4)      bf16 scratch (keys for the whole sequence)
    # acc_scr: (N, C)       f32 scratch  (out accumulator)
    t = pl.program_id(1)

    @pl.when(t == 0)
    def _init():
        # Project k for the whole sequence once per batch; keep it in bf16.
        x_full = x_ref[0].astype(jnp.bfloat16)                      # (N, C)
        k_scr[...] = jnp.dot(x_full, wkt_ref[...],
                             preferred_element_type=jnp.float32
                             ).astype(jnp.bfloat16)                 # (N, C4)
        acc_scr[...] = jnp.zeros_like(acc_scr)

    i = pl.multiple_of(t * tq, tq)
    x_tile = x_ref[0, pl.ds(i, tq), :].astype(jnp.bfloat16)         # (TQ, C)

    # Fused q/v projection: [q | v] = x_tile @ [Wq^T*scale | Wv^T] + [0 | bv]
    qv = jnp.dot(x_tile, wqv_ref[...],
                 preferred_element_type=jnp.float32) + bqv_ref[...]  # (TQ, C4+C)
    q = qv[:, :c4]                                                   # (TQ, C4)
    v = qv[:, c4:]                                                   # (TQ, C)

    # energy[n, m] = q[n] . k[m]   (softmax scale already folded into Wq)
    energy = jax.lax.dot_general(
        q.astype(jnp.bfloat16), k_scr[...],
        (((1,), (1,)), ((), ())),
        preferred_element_type=jnp.float32)                          # (TQ, N)

    # numerically-stable softmax over the key axis (float32, EUP reciprocal)
    m = jnp.max(energy, axis=-1, keepdims=True)
    p = jnp.exp(energy - m)
    att = p * pl.reciprocal(jnp.sum(p, axis=-1, keepdims=True), approx=True)

    att_ref[0] = att.astype(att_ref.dtype)

    # x_r (channels-last) contribution of this query tile: att_tile^T @ v_tile
    acc_scr[...] += jax.lax.dot_general(
        att.astype(jnp.bfloat16), v.astype(jnp.bfloat16),
        (((0,), (0,)), ((), ())),
        preferred_element_type=jnp.float32)                          # (N, C)

    # residual term: rows belonging to this tile get their own v added once
    acc_scr[pl.ds(i, tq), :] += v

    @pl.when(t == pl.num_programs(1) - 1)
    def _finalize():
        out_ref[0] = acc_scr[...].astype(out_ref.dtype)


def _pick_tile(n, target=256):
    """Largest query tile <= target that divides N and is a multiple of 8."""
    if n <= target:
        return n
    for cand in range(target, 7, -8):
        if cand % 8 == 0 and n % cand == 0:
            return cand
    return n  # fall back to a single full-sequence tile


def a_scn_forward(x, w_q, w_k, w_v, b_v, *, tq=None, att_dtype=jnp.float32):
    """x: (B, N, C).  PyTorch Conv1d weights: w_q, w_k: (C//4, C),
       w_v: (C, C), b_v: (C,).  Returns (out (B,N,C), att (B,N,N))."""
    B, N, C = x.shape
    assert C % 4 == 0, "channels must be divisible by 4"
    C4 = C // 4
    if tq is None:
        tq = _pick_tile(N)
    assert N % tq == 0 and (tq % 8 == 0 or tq == N), "bad query tile size"
    T = N // tq

    scale = 1.0 / math.sqrt(C4)
    # Fused [q | v] projection weights; softmax scale folded into Wq; bf16 MXU.
    w_qv = jnp.concatenate(
        [jnp.transpose(w_q) * scale, jnp.transpose(w_v)], axis=1
    ).astype(jnp.bfloat16)                                           # (C, C4+C)
    b_qv = jnp.concatenate(
        [jnp.zeros((C4,), jnp.float32), b_v.astype(jnp.float32)]
    ).reshape(1, C4 + C)                                             # (1, C4+C)
    w_kt = jnp.transpose(w_k).astype(jnp.bfloat16)                   # (C, C4)

    # VMEM budget: double-buffered blocks + scratch + live (TQ, N) slabs.
    est = (4 * (2 * N * C            # x block
                + 2 * N * C          # out block
                + 2 * tq * N         # att block
                + N * C              # accumulator scratch
                + 8 * tq * N)        # live energy/p/att intermediates
           + 2 * (N * C4 + C * (C4 + C))   # bf16 k scratch + weights
           + (2 << 20))
    vmem_limit = int(min(max(est, 4 << 20), 64 << 20))

    kernel = functools.partial(_a_scn_kernel, tq=tq, c4=C4)

    out_shape = (
        jax.ShapeDtypeStruct((B, N, C), x.dtype),
        jax.ShapeDtypeStruct((B, N, N), att_dtype),
    )

    return pl.pallas_call(
        kernel,
        out_shape=out_shape,
        grid_spec=pltpu.PrefetchScalarGridSpec(
            num_scalar_prefetch=0,
            grid=(B, T),
            in_specs=[
                pl.BlockSpec((1, N, C), lambda b, t: (b, 0, 0)),      # x (resident per batch)
                pl.BlockSpec((C, C4 + C), lambda b, t: (0, 0)),       # w_qv
                pl.BlockSpec((1, C4 + C), lambda b, t: (0, 0)),       # b_qv
                pl.BlockSpec((C, C4), lambda b, t: (0, 0)),           # w_kt
            ],
            out_specs=[
                pl.BlockSpec((1, N, C), lambda b, t: (b, 0, 0)),      # out (reduced over t)
                pl.BlockSpec((1, tq, N), lambda b, t: (b, t, 0)),     # att tile
            ],
            scratch_shapes=[
                pltpu.VMEM((N, C4), jnp.bfloat16),   # k for the whole sequence
                pltpu.VMEM((N, C), jnp.float32),     # out accumulator
            ],
        ),
        compiler_params=pltpu.CompilerParams(
            dimension_semantics=("parallel", "arbitrary"),
            vmem_limit_bytes=vmem_limit),
    )(x, w_qv, b_qv, w_kt)


def a_scn_reference(x, w_q, w_k, w_v, b_v):
    """Pure-JAX reference with the exact PyTorch math (channels-last form)."""
    q = jnp.einsum("bnc,dc->bnd", x, w_q)                  # (B, N, C4)
    k = jnp.einsum("bnc,dc->bnd", x, w_k)                  # (B, N, C4)
    v = jnp.einsum("bnc,dc->bnd", x, w_v) + b_v            # (B, N, C)
    energy = jnp.einsum("bnd,bmd->bnm", q, k) / math.sqrt(q.shape[-1])
    att = jax.nn.softmax(energy, axis=-1)                  # (B, N, N)
    x_r = jnp.einsum("bnm,bnc->bmc", att, v)               # att^T @ v
    return v + x_r, att


if __name__ == "__main__":
    B, N, C = 2, 32, 32   # channels must be divisible by 4

    key = jax.random.PRNGKey(0)
    kx, kq, kk, kv, kb = jax.random.split(key, 5)

    x = jax.random.normal(kx, (B, N, C), dtype=jnp.float32)
    # Conv1d weights (kernel size 1) -> plain matrices, deterministic init
    w_q = 0.1 * jax.random.normal(kq, (C // 4, C), dtype=jnp.float32)
    w_k = 0.1 * jax.random.normal(kk, (C // 4, C), dtype=jnp.float32)
    w_v = 0.1 * jax.random.normal(kv, (C, C), dtype=jnp.float32)
    b_v = 0.1 * jax.random.normal(kb, (C,), dtype=jnp.float32)

    # tq=8 -> 4 query tiles per batch: exercises t==0 init, cross-tile
    # accumulation into the resident out block, and last-tile finalize.
    out, att = a_scn_forward(x, w_q, w_k, w_v, b_v, tq=8)
    jax.block_until_ready((out, att))

    ref_out, ref_att = a_scn_reference(x, w_q, w_k, w_v, b_v)
    assert out.shape == (B, N, C) and att.shape == (B, N, N)
    # bf16 MXU operands (with f32 accumulation) -> loosened tolerance vs f32 ref
    assert jnp.allclose(att, ref_att, rtol=2e-2, atol=2e-2), \
        float(jnp.max(jnp.abs(att - ref_att)))
    assert jnp.allclose(out, ref_out, rtol=2e-2, atol=2e-2), \
        float(jnp.max(jnp.abs(out - ref_out)))

    print("KERNEL_OK")
</pallas_src>

<mosaic_0001>
module attributes {stable_mosaic.version = 11 : i64} {
  func.func @_a_scn_kernel(%arg0: i32, %arg1: i32, %arg2: memref<1x32x32xf32, #tpu.memory_space<vmem>>, %arg3: memref<32x40xbf16, #tpu.memory_space<vmem>>, %arg4: memref<1x40xf32, #tpu.memory_space<vmem>>, %arg5: memref<32x8xbf16, #tpu.memory_space<vmem>>, %arg6: memref<1x32x32xf32, #tpu.memory_space<vmem>>, %arg7: memref<1x8x32xf32, #tpu.memory_space<vmem>>, %arg8: memref<32x8xbf16, #tpu.memory_space<vmem>>, %arg9: memref<32x32xf32, #tpu.memory_space<vmem>>) attributes {dimension_semantics = [#tpu.dimension_semantics<parallel>, #tpu.dimension_semantics<arbitrary>], iteration_bounds = array<i64: 2, 4>, scalar_prefetch = 0 : i64, scratch_operands = 2 : i64, tpu.core_type = #tpu.core_type<tc>, window_params = [{transform_indices = @transform_0, window_bounds = array<i64: 1, 32, 32>}, {pipeline_mode = #tpu.pipeline_mode<synchronous>, transform_indices = @transform_1, window_bounds = array<i64: 32, 40>}, {pipeline_mode = #tpu.pipeline_mode<synchronous>, transform_indices = @transform_2, window_bounds = array<i64: 1, 40>}, {pipeline_mode = #tpu.pipeline_mode<synchronous>, transform_indices = @transform_3, window_bounds = array<i64: 32, 8>}, {transform_indices = @transform_4, window_bounds = array<i64: 1, 32, 32>}, {transform_indices = @transform_5, window_bounds = array<i64: 1, 8, 32>}]} {
    %c0_i32 = arith.constant 0 : i32
    %0 = arith.cmpi eq, %arg1, %c0_i32 : i32
    %1 = arith.extui %0 : i1 to i32
    %c0_i32_0 = arith.constant 0 : i32
    %2 = arith.cmpi ne, %1, %c0_i32_0 : i32
    scf.if %2 {
      %c0_22 = arith.constant 0 : index
      %c0_23 = arith.constant 0 : index
      %c0_24 = arith.constant 0 : index
      %46 = vector.load %arg2[%c0_22, %c0_23, %c0_24] : memref<1x32x32xf32, #tpu.memory_space<vmem>>, vector<1x32x32xf32>
      %47 = vector.shape_cast %46 : vector<1x32x32xf32> to vector<32x32xf32>
      %48 = arith.truncf %47 : vector<32x32xf32> to vector<32x32xbf16>
      %c0_25 = arith.constant 0 : index
      %c0_26 = arith.constant 0 : index
      %49 = vector.load %arg5[%c0_25, %c0_26] : memref<32x8xbf16, #tpu.memory_space<vmem>>, vector<32x8xbf16>
      %cst_27 = arith.constant dense<0.000000e+00> : vector<32x8xf32>
      %50 = tpu.matmul %48, %49, %cst_27 {dimension_numbers = #tpu.dot_dimension_numbers<[1], [0], [0], [1], [0, 0, 1, 1], [], []>} : vector<32x32xbf16>, vector<32x8xbf16>, vector<32x8xf32> -> vector<32x8xf32>
      %51 = arith.truncf %50 : vector<32x8xf32> to vector<32x8xbf16>
      %c0_28 = arith.constant 0 : index
      %c0_29 = arith.constant 0 : index
      %52 = vector.load %arg8[%c0_28, %c0_29] : memref<32x8xbf16, #tpu.memory_space<vmem>>, vector<32x8xbf16>
      tpu.vector_store %arg8[%c0_28, %c0_29], %51 {strides = array<i32>} : memref<32x8xbf16, #tpu.memory_space<vmem>>, vector<32x8xbf16>,
      %cst_30 = arith.constant 0.000000e+00 : f32
      %53 = vector.broadcast %cst_30 : f32 to vector<32x32xf32>
      %c0_31 = arith.constant 0 : index
      %c0_32 = arith.constant 0 : index
      %54 = vector.load %arg9[%c0_31, %c0_32] : memref<32x32xf32, #tpu.memory_space<vmem>>, vector<32x32xf32>
      tpu.vector_store %arg9[%c0_31, %c0_32], %53 {strides = array<i32>} : memref<32x32xf32, #tpu.memory_space<vmem>>, vector<32x32xf32>,
    } else {
    }
    %c8_i32 = arith.constant 8 : i32
    %3 = arith.muli %arg1, %c8_i32 : i32
    %4 = tpu.assume_multiple %3, 8 : i32
    %c0 = arith.constant 0 : index
    %5 = arith.index_cast %4 : i32 to index
    %c0_1 = arith.constant 0 : index
    %6 = vector.load %arg2[%c0, %5, %c0_1] : memref<1x32x32xf32, #tpu.memory_space<vmem>>, vector<1x8x32xf32>
    %7 = vector.shape_cast %6 : vector<1x8x32xf32> to vector<8x32xf32>
    %8 = arith.truncf %7 : vector<8x32xf32> to vector<8x32xbf16>
    %c0_2 = arith.constant 0 : index
    %c0_3 = arith.constant 0 : index
    %9 = vector.load %arg3[%c0_2, %c0_3] : memref<32x40xbf16, #tpu.memory_space<vmem>>, vector<32x40xbf16>
    %cst = arith.constant dense<0.000000e+00> : vector<8x40xf32>
    %10 = tpu.matmul %8, %9, %cst {dimension_numbers = #tpu.dot_dimension_numbers<[1], [0], [0], [1], [0, 0, 1, 1], [], []>} : vector<8x32xbf16>, vector<32x40xbf16>, vector<8x40xf32> -> vector<8x40xf32>
    %c0_4 = arith.constant 0 : index
    %c0_5 = arith.constant 0 : index
    %11 = vector.load %arg4[%c0_4, %c0_5] : memref<1x40xf32, #tpu.memory_space<vmem>>, vector<1x40xf32>
    %12 = vector.broadcast %11 : vector<1x40xf32> to vector<8x40xf32>
    %13 = arith.addf %10, %12 : vector<8x40xf32>
    %14 = vector.extract_strided_slice %13 {offsets = [0, 0], sizes = [8, 8], strides = [1, 1]} : vector<8x40xf32> to vector<8x8xf32>
    %15 = vector.extract_strided_slice %13 {offsets = [0, 8], sizes = [8, 32], strides = [1, 1]} : vector<8x40xf32> to vector<8x32xf32>
    %16 = arith.truncf %14 : vector<8x8xf32> to vector<8x8xbf16>
    %c0_6 = arith.constant 0 : index
    %c0_7 = arith.constant 0 : index
    %17 = vector.load %arg8[%c0_6, %c0_7] : memref<32x8xbf16, #tpu.memory_space<vmem>>, vector<32x8xbf16>
    %cst_8 = arith.constant dense<0.000000e+00> : vector<8x32xf32>
    %18 = tpu.matmul %16, %17, %cst_8 {dimension_numbers = #tpu.dot_dimension_numbers<[1], [1], [0], [0], [0, 0, 1, 0], [], []>} : vector<8x8xbf16>, vector<32x8xbf16>, vector<8x32xf32> -> vector<8x32xf32>
    %cst_9 = arith.constant dense<0xFF800000> : vector<8xf32>
    %19 = vector.multi_reduction <maximumf>, %18, %cst_9 [1] : vector<8x32xf32> to vector<8xf32>
    %20 = vector.shape_cast %19 : vector<8xf32> to vector<8x1xf32>
    %21 = vector.broadcast %20 : vector<8x1xf32> to vector<8x32xf32>
    %22 = arith.subf %18, %21 : vector<8x32xf32>
    %23 = math.exp %22 : vector<8x32xf32>
    %cst_10 = arith.constant dense<0.000000e+00> : vector<8xf32>
    %24 = vector.multi_reduction <add>, %23, %cst_10 [1] : vector<8x32xf32> to vector<8xf32>
    %25 = vector.shape_cast %24 : vector<8xf32> to vector<8x1xf32>
    %26 = tpu.reciprocal %25 {approx = true} : vector<8x1xf32> -> vector<8x1xf32>
    %27 = vector.broadcast %26 : vector<8x1xf32> to vector<8x32xf32>
    %28 = arith.mulf %23, %27 : vector<8x32xf32>
    %c0_11 = arith.constant 0 : index
    %c0_12 = arith.constant 0 : index
    %c0_13 = arith.constant 0 : index
    %29 = vector.load %arg7[%c0_11, %c0_12, %c0_13] : memref<1x8x32xf32, #tpu.memory_space<vmem>>, vector<1x8x32xf32>
    %30 = vector.shape_cast %29 : vector<1x8x32xf32> to vector<8x32xf32>
    %31 = vector.shape_cast %28 : vector<8x32xf32> to vector<1x8x32xf32>
    tpu.vector_store %arg7[%c0_11, %c0_12, %c0_13], %31 {strides = array<i32>} : memref<1x8x32xf32, #tpu.memory_space<vmem>>, vector<1x8x32xf32>,
    %c0_14 = arith.constant 0 : index
    %c0_15 = arith.constant 0 : index
    %32 = vector.load %arg9[%c0_14, %c0_15] : memref<32x32xf32, #tpu.memory_space<vmem>>, vector<32x32xf32>
    %33 = arith.truncf %28 : vector<8x32xf32> to vector<8x32xbf16>
    %34 = arith.truncf %15 : vector<8x32xf32> to vector<8x32xbf16>
    %cst_16 = arith.constant dense<0.000000e+00> : vector<32x32xf32>
    %35 = tpu.matmul %33, %34, %cst_16 {dimension_numbers = #tpu.dot_dimension_numbers<[0], [0], [1], [1], [0, 1, 1, 1], [], []>} : vector<8x32xbf16>, vector<8x32xbf16>, vector<32x32xf32> -> vector<32x32xf32>
    %36 = arith.addf %32, %35 : vector<32x32xf32>
    %c0_17 = arith.constant 0 : index
    %c0_18 = arith.constant 0 : index
    %37 = vector.load %arg9[%c0_17, %c0_18] : memref<32x32xf32, #tpu.memory_space<vmem>>, vector<32x32xf32>
    tpu.vector_store %arg9[%c0_17, %c0_18], %36 {strides = array<i32>} : memref<32x32xf32, #tpu.memory_space<vmem>>, vector<32x32xf32>,
    %38 = arith.index_cast %4 : i32 to index
    %c0_19 = arith.constant 0 : index
    %39 = vector.load %arg9[%38, %c0_19] : memref<32x32xf32, #tpu.memory_space<vmem>>, vector<8x32xf32>
    %40 = arith.addf %39, %15 : vector<8x32xf32>
    %41 = arith.index_cast %4 : i32 to index
    %c0_20 = arith.constant 0 : index
    %42 = vector.load %arg9[%41, %c0_20] : memref<32x32xf32, #tpu.memory_space<vmem>>, vector<8x32xf32>
    tpu.vector_store %arg9[%41, %c0_20], %40 {strides = array<i32>} : memref<32x32xf32, #tpu.memory_space<vmem>>, vector<8x32xf32>,
    %c3_i32 = arith.constant 3 : i32
    %43 = arith.cmpi eq, %arg1, %c3_i32 : i32
    %44 = arith.extui %43 : i1 to i32
    %c0_i32_21 = arith.constant 0 : i32
    %45 = arith.cmpi ne, %44, %c0_i32_21 : i32
    scf.if %45 {
      %c0_22 = arith.constant 0 : index
      %c0_23 = arith.constant 0 : index
      %46 = vector.load %arg9[%c0_22, %c0_23] : memref<32x32xf32, #tpu.memory_space<vmem>>, vector<32x32xf32>
      %c0_24 = arith.constant 0 : index
      %c0_25 = arith.constant 0 : index
      %c0_26 = arith.constant 0 : index
      %47 = vector.load %arg6[%c0_24, %c0_25, %c0_26] : memref<1x32x32xf32, #tpu.memory_space<vmem>>, vector<1x32x32xf32>
      %48 = vector.shape_cast %47 : vector<1x32x32xf32> to vector<32x32xf32>
      %49 = vector.shape_cast %46 : vector<32x32xf32> to vector<1x32x32xf32>
      tpu.vector_store %arg6[%c0_24, %c0_25, %c0_26], %49 {strides = array<i32>} : memref<1x32x32xf32, #tpu.memory_space<vmem>>, vector<1x32x32xf32>,
    } else {
    }
    return
  }
  func.func @transform_0(%arg0: i32, %arg1: i32) -> (i32, i32, i32) {
    %c0_i32 = arith.constant 0 : i32
    %c0_i32_0 = arith.constant 0 : i32
    %c0_i32_1 = arith.constant 0 : i32
    return %arg0, %c0_i32, %c0_i32_0 : i32, i32, i32
  }
  func.func @transform_1(%arg0: i32, %arg1: i32) -> (i32, i32) {
    %c0_i32 = arith.constant 0 : i32
    %c0_i32_0 = arith.constant 0 : i32
    %c0_i32_1 = arith.constant 0 : i32
    return %c0_i32, %c0_i32_0 : i32, i32
  }
  func.func @transform_2(%arg0: i32, %arg1: i32) -> (i32, i32) {
    %c0_i32 = arith.constant 0 : i32
    %c0_i32_0 = arith.constant 0 : i32
    %c0_i32_1 = arith.constant 0 : i32
    return %c0_i32, %c0_i32_0 : i32, i32
  }
  func.func @transform_3(%arg0: i32, %arg1: i32) -> (i32, i32) {
    %c0_i32 = arith.constant 0 : i32
    %c0_i32_0 = arith.constant 0 : i32
    %c0_i32_1 = arith.constant 0 : i32
    return %c0_i32, %c0_i32_0 : i32, i32
  }
  func.func @transform_4(%arg0: i32, %arg1: i32) -> (i32, i32, i32) {
    %c0_i32 = arith.constant 0 : i32
    %c0_i32_0 = arith.constant 0 : i32
    %c0_i32_1 = arith.constant 0 : i32
    return %arg0, %c0_i32, %c0_i32_0 : i32, i32, i32
  }
  func.func @transform_5(%arg0: i32, %arg1: i32) -> (i32, i32, i32) {
    %c0_i32 = arith.constant 0 : i32
    %c0_i32_0 = arith.constant 0 : i32
    return %arg0, %arg1, %c0_i32 : i32, i32, i32
  }
}

</mosaic_0001>

<bundles_post_ra>
// kernel: tpu_custom_call.1
= control target key start
LH: loop header
LB: loop body
LE: loop exit
PB: predicated region body
PF: predicated region fallthrough
CT: control target
= control target key end

     0   :  { %s1541_s0 = inlined_call_operand.hbm [shape: f32[2,32,32], index: 0, kind: input, shape index: {}]   ;;  %s1542_s1 = inlined_call_operand.vmem [shape: bf16[32,40], index: 1, kind: input, shape index: {}]   ;;  %s1543_s2 = inlined_call_operand.vmem [shape: f32[1,40], index: 2, kind: input, shape index: {}]   ;;  %s1544_s3 = inlined_call_operand.vmem [shape: bf16[32,8], index: 3, kind: input, shape index: {}]   ;;  %s1545_s4 = inlined_call_operand.hbm [shape: f32[2,32,32], index: 4, kind: output, shape index: {0}]   ;;  %s1546_s5 = inlined_call_operand.hbm [shape: f32[2,32,32], index: 5, kind: output, shape index: {1}]  }
   0x1   :  { %1556 = sst [smem:[#allocation21_spill]] %s1541_s0 }
   0x2   :  { %1557 = sst [smem:[#allocation22_spill]] %s1542_s1 }
   0x3   :  { %1558 = sst [smem:[#allocation23_spill]] %s1543_s2 }
   0x4   :  { %1559 = sst [smem:[#allocation24_spill]] %s1544_s3 }
   0x5   :  { %11 = vsyncpa [#allocation5], 0 }
   0x6   :  { %13 = vsyncpa [#allocation5 + $0x1], 0 }
   0x7   :  { %14 = vsyncpa [#allocation6], 0 }
   0x8   :  { %16 = vsyncpa [#allocation6 + $0x1], 0 }
   0x9   :  { %17 = vsyncpa [#allocation9], 0 }
   0xa   :  { %19 = vsyncpa [#allocation9 + $0x1], 0  ;;  %s1227_s18 = smov 0   ;;  %s1229_s19 = smov 0  }
   0xb   :  { %s1231_s20 = smov 0   ;;  %s1233_s21 = smov 0  }
   0xc   :  { %s1235_s22 = smov 0   ;;  %s1237_s23 = smov 0  }
   0xd   :  { %s1239_s24 = smov 0   ;;  %s1241_s25 = smov 0  }
   0xe   :  { %s1243_s26 = smov 0   ;;  %s1245_s27 = smov 0  }
   0xf   :  { %s1247_s28 = smov 0  }
  0x10 LB: > { %1560 = sst [smem:[#allocation13_spill]] %s1156_s21  ;;  %s791_s29 = sadd.s32 4294967295, %s1184_s28   ;;  %s1184_s28 = sphi %s1247_s28, %s25_s28   ;;  %s1180_s27 = sphi %s1245_s27, %s1592_s27   ;;  %s1176_s26 = sphi %s1243_s26, %s1591_s26   ;;  %s1172_s25 = sphi %s1241_s25, %s1590_s25   ;;  %s1168_s24 = sphi %s1239_s24, %s1589_s24   ;;  %s1164_s23 = sphi %s1237_s23, %s1588_s23   ;;  %s1160_s22 = sphi %s1235_s22, %s1597_s22   ;;  %s1156_s21 = sphi %s1233_s21, %s1596_s21   ;;  %s1152_s20 = sphi %s1231_s20, %s1595_s20   ;;  %s1148_s19 = sphi %s1229_s19, %s1594_s19   ;;  %s1144_s18 = sphi %s1227_s18, %s1593_s18  }
  0x11   : > { %1561 = sst [smem:[#allocation14_spill]] %s1164_s23  ;;  %s792_s30 = sadd.s32 4294967294, %s1184_s28  }
  0x12   : > { %1562 = sst [smem:[#allocation15_spill]] %s1176_s26  ;;  %s34_s6 = sadd.s32 1, %s1176_s26 }
  0x13   : > { %1563 = sst [smem:[#allocation16_spill]] %s1180_s27  ;;  %s37_s7 = sadd.s32 1, %s1180_s27 }
  0x14   : > { %p35_p0 = scmp.ge.s32.totalorder %s34_s6, 4  ;;  %s44_s8 = sadd.s32 1, %s1164_s23 }
  0x15   : > { %p51_p1 = scmp.ne.s32.totalorder %s1164_s23, %s1160_s22  ;;  %p52_p2 = scmp.eq.s32.totalorder %s1184_s28, 0 }
  0x16   : > { %s1599_s6 = smov (%p35_p0, %s34_s6), 0  ;;  %s1601_s7 = smov (!%p35_p0, %s37_s7), %s1180_s27 }
  0x17   : > { %1564 = sst [smem:[#allocation17_spill]] %s1599_s6  ;;  %p1293_p3 = por %p52_p2, %p51_p1 }
  0x18   : > { %p57_p4 = scmp.ne.s32.totalorder %s1160_s22, %s1156_s21  ;;  %p39_p5 = scmp.ge.s32.totalorder %s1601_s7, 2 }
  0x19   : > { %p58_p6 = scmp.eq.s32.totalorder %s791_s29, 0  ;;  %p1299_p7 = scmp.eq.s32.totalorder %s791_s29, 7 }
  0x1a   : > { %p1303_p8 = scmp.eq.s32.totalorder %s792_s30, 7  ;;  %s1603_s7 = smov (%p39_p5, %s1601_s7), 0 }
  0x1b   : > { %1568 = sst [smem:[#allocation18_spill]] %s1603_s7  ;;  %p1309_p9 = por %p58_p6, %p57_p4 }
  0x1c   : > { %p1315_p10 = por %p1299_p7, %p51_p1  ;;  %s41_s14 = ssub.s32 %s1180_s27, %s1603_s7 }
  0x1d   : > { %p1323_p11 = por %p1303_p8, %p57_p4  ;;  %p42_p12 = scmp.eq.s32.totalorder %s41_s14, 0 }
  0x1e   : > { %s157_s16 = ssub.s32 %s1176_s26, %s1599_s6  ;;  %s161_s29 = sadd.s32 1, %s1152_s20 }
  0x1f   : > { %s1571_s15 = scalar_select %p1323_p11, 1, 0 }
  0x20   : > { %s158_s17 = sor.u32 %s157_s16, %s41_s14  ;;  %p171_p0 = scmp.ne.s32.totalorder %s1152_s20, %s1148_s19 }
  0x21   : > { %1572 = sst [smem:[#allocation19_spill]] %s1571_s15  ;;  %p159_p13 = scmp.eq.s32.totalorder %s158_s17, 0 }
  0x22   : > { %s1331_s30 = scalar_select %p42_p12, %s1164_s23, %s44_s8  }
  0x23   : > { %p177_p1 = scmp.ne.s32.totalorder %s1148_s19, %s1144_s18  ;;  %p1342_p2 = por %p171_p0, %p1299_p7 }
  0x24   : > { %1573 = sst [smem:[#allocation20_spill]] %s1331_s30  ;;  %p897_p5 = scmp.lt.s32.totalorder %s1184_s28, 8 }
  0x25   : > { %s1338_s21 = scalar_select %p159_p13, %s1152_s20, %s161_s29  }
  0x26   : > { %p1348_p4 = por %p177_p1, %p1303_p8  ;;  %s207_s14 = sand.u32 1, %s1164_s23  }
  0x27   : > { %s795_s8 = sshll.u32 %s207_s14, 5  ;;  %s830_s16 = sshll.u32 %s1180_s27, 9 }
  0x28   : > { %s1575_s15 = scalar_select %p1348_p4, 1, 0 }
  0x29   : > { %s1576_s0 = sld [smem:[#allocation21_spill]]  ;;  %s211_s29 = scalar_lea.vmem [#allocation4], %s795_s8 }
  0x2a   : > { %s218_s30 = sshll.u32 %s211_s29, 4  ;;  %p1360_p6 = pnand %p897_p5, %p1293_p3  ;;  %s219_s30 = int_to_ptr.vmem [resolvable:$true] %s218_s30 }
  0x2b   : > { %p798_p7 = scmp.ge.s32.totalorder %s1184_s28, 1  ;;  %s208_s11 = scalar_lea.sflag [#allocation5], %s207_s14 }
  0x2c   : > { %p1008_p8 = pneg %p1360_p6  ;;  %s1019_s23 = scalar_lea.vmem %s219_s30, 512 }
  0x2d   : > { %p1020_p12 = scmp.ne.s32.totalorder %s219_s30, %s1019_s23  ;;  %s1186_s27 = smov [#allocation4]  }
  0x2e   : > { %s1024_s6 = sshll.u32 %s1186_s27, 4  ;;  %s1025_s6 = int_to_ptr.vmem [resolvable:$false] %s1024_s6 }
  0x2f   : > { %s217_s26 = scalar_lea.hbm %s1576_s0, %s830_s16  ;;  %p1022_p13 = pnand %p1020_p12, %p1008_p8 }
  0x30   : > { %s1026_s8 = scalar_lea.vmem %s1025_s6, 1024  ;;  %p1027_p1 = scmp.lt.s32.totalorder %s219_s30, %s1025_s6 }
  0x31   : > { %p1023_p0 = pneg %p1022_p13  ;;  %p1028_p4 = scmp.lt.s32.totalorder %s1026_s8, %s1019_s23 }
  0x33   : > { %p1029_p11 = por %p1028_p4, %p1027_p1 }
  0x35   : > { %p1030_p3 = pnand %p1029_p11, %p1023_p0 }
  0x37   : > { %1033 = shalt.err (!%p1030_p3)
}
  0x38   : > { %s1187_s9 = smov 128   ;;  %s1188_s14 = smov 8  }
  0x39   : > { %889 = dma.hbm_to_vmem [thread:$0]  (!%p1360_p6), %s217_s26, 512, %s219_s30, %s208_s11, %s1187_s9, %s1187_s9, %s1188_s14  }
  0x3a   : > { %p226_p5 = scmp.lt.s32.totalorder %s1184_s28, 9 }
  0x3c   : > { %p227_p8 = pnand %p798_p7, %p226_p5 }
  0x3d   : > { %s1373_s27 = sand.u32 (!%p227_p8), 1, %s1160_s22  }
  0x3e   : > { %230 = sbr.rel (%p227_p8) target bundleno = 1378 (0x562), region = 36  ;;  %s799_s23 = sshll.u32 (!%p227_p8), %s1373_s27, 5 }
  0x3f   : > { %s233_s16 = scalar_lea.sflag (!%p227_p8), [#allocation5], %s1373_s27  ;;  %s1377_s17 = scalar_lea.vmem (!%p227_p8), [#allocation4], %s799_s23 }
  0x43   : > { %1131 = dma.done.wait (%p1309_p9), %s233_s16, 512  }
  0x44   : > { %1133 = vsyncadd (%p1309_p9), %s233_s16, 4294966784  ;;  %s1554_s26 = sand.u32 1, %s1148_s19   ;;  %s1388_s29 = scalar_lea.vmem [#allocation7], %s799_s23 }
  0x45   : > { %s1386_s30 = sshll.u32 %s1554_s26, 3  ;;  %p802_p11 = scmp.ne.s32.totalorder %s1168_s24, 0 }
  0x46   : > { %s1555_s10 = scalar_lea.vmem [#allocation8], %s1386_s30  ;;  %s1578_s3 = sld [smem:[#allocation24_spill]] (!%p802_p11) }
  0x47   : > { %272 = sbr.rel (%p802_p11) target bundleno = 287 (0x11f), region = 44 }
  0x4c   : > { %v996_v0 = vld [vmem:[%s1578_s3 + $0x8] sm:$0xff]   ;;  %vm295_vm0 = vcmask 261120   ;;  %v997_v1 = vld [vmem:[%s1578_s3] sm:$0xff]   ;;  %v273_v2 = vld [vmem:[%s1377_s17] sm:$0xff]  ;;  %v1189_v4 = vmov 0.0   ;;  %vm367_vm1 = vcmask 60416  }
  0x4d   : > { %849 = vmatprep.subr.bf16.mxu0 %v996_v0  ;;  %v274_v3 = vld [vmem:[%s1377_s17 + $0x8] sm:$0xff]  ;;  %372 = vst.msk [vmem:[#allocation3] sm:$0xff] %vm295_vm0, %v1189_v4  ;;  %373 = vst.msk [vmem:[#allocation3 + $0x8] sm:$0xff] %vm295_vm0, %v1189_v4  ;;  %v275_v6 = vld [vmem:[%s1377_s17 + $0x10] sm:$0xff] }
  0x4e   : > { %374 = vst.msk [vmem:[#allocation3 + $0x10] sm:$0xff] %vm295_vm0, %v1189_v4  ;;  %375 = vst.msk [vmem:[#allocation3 + $0x18] sm:$0xff] %vm295_vm0, %v1189_v4  ;;  %850 = vmatpush3.bf16.msra.mxu0 %v996_v0  ;;  %v277_v5 = vpack.c.bf16 %v274_v3, %v273_v2  ;;  %v276_v7 = vld [vmem:[%s1377_s17 + $0x18] sm:$0xff] }
  0x4f   : > { %851 = vmatprep.subr.bf16.mxu0 %v997_v1  ;;  %v278_v8 = vpack.c.bf16 %v276_v7, %v275_v6 }
  0x50   : > { %853 = vmatprep.mubr.msk.bf16.mxu0 %vm295_vm0, %v277_v5 }
  0x52   : > { %852 = vmatpush3.bf16.msra.mxu0 %v997_v1 }
  0x55   : > { %854 = vmatmul.mubr.msk.bf16.vlgmr.msra.gmra.mxu0 %vm295_vm0, %v278_v8 }
 0x115   : > { %v855_v9 = vpop.f32.mrf.mxu0 }
 0x116   : > { %v833_v10 = vpack.c.bf16 %v855_v9, %v855_v9 }
 0x117   : > { %v336_v11 = vpop.f32.mrf.mxu0 }
 0x118   : > { %370 = vst.msk [vmem:[#allocation2 + $0x8] sm:$0xf] %vm367_vm1, %v833_v10  ;;  %v831_v12 = vpack.c.bf16 %v336_v11, %v336_v11 }
 0x119   : > { %v856_v13 = vpop.f32.mrf.mxu0 }
 0x11a   : > { %368 = vst.msk [vmem:[#allocation2] sm:$0xf] %vm367_vm1, %v831_v12  ;;  %v834_v14 = vpack.c.bf16 %v856_v13, %v856_v13 }
 0x11b   : > { %v339_v15 = vpop.f32.mrf.mxu0 }
 0x11c   : > { %371 = vst.msk [vmem:[#allocation2 + $0xc] sm:$0xf] %vm367_vm1, %v834_v14  ;;  %v832_v16 = vpack.c.bf16 %v339_v15, %v339_v15 }
 0x11e   : > { %369 = vst.msk [vmem:[#allocation2 + $0x4] sm:$0xf] %vm367_vm1, %v832_v16 }
 0x11f PF: > { %s1579_s1 = sld [smem:[#allocation22_spill]]  ;;  %v1190_v18 = vmov 0.0   ;;  %vm1191_vm2 = vmmov 0   ;;  %s811_s11 = sshll.u32 %s1168_s24, 3  ;;  %vm462_vm3 = vcmask 64512   ;;  %vm403_vm4 = vcmask 261120  }
 0x120   : > { %857 = vmatprep.subr.bf16.mxu0 %v1190_v18  ;;  %865 = vmatprep.subr.bf16.mxu1 %v1190_v18  ;;  %s377_s6 = scalar_lea.vmem %s1377_s17, %s811_s11 [#allocation4]  ;;  %s1580_s2 = sld [smem:[#allocation23_spill]]  ;;  %vm554_vm5 = vcmask 1043456   ;;  %v526_v51 = vld [vmem:[#allocation3 + $0x10] sm:$0xff]  ;;  %v524_v53 = vld [vmem:[#allocation3] sm:$0xff]  ;;  %v527_v56 = vld [vmem:[#allocation3 + $0x18] sm:$0xff] }
 0x121   : > { %861 = vmatprep.mubr.msk.bf16.mxu0 %vm1191_vm2, %v1190_v18  ;;  %869 = vmatprep.mubr.msk.bf16.mxu1 %vm1191_vm2, %v1190_v18  ;;  %v378_v21 = vld [vmem:[%s377_s6] sm:$0xff]  ;;  %s1192_s17 = smov 120   ;;  %v525_v59 = vld [vmem:[#allocation3 + $0x8] sm:$0xff]  ;;  %s615_s9 = scalar_lea.vmem [#allocation3], %s811_s11 }
 0x122   : > { %v379_v22 = vpack.c.bf16 %v378_v21, %v378_v21  ;;  %p821_p9 = scmp.ne.s32.totalorder %s1168_s24, 3 }
 0x123   : > { %v1000_v20 = vld [vmem:[#allocation2 + $0x8] sm:$0xff]  }
 0x124   : > { %v470_v23 = vsel %vm462_vm3, %v1000_v20, 0 }
 0x125   : > { %v998_v17 = vld [vmem:[%s1579_s1 + $0x8] sm:$0xff]   ;;  %v999_v19 = vld [vmem:[%s1579_s1] sm:$0xff]   ;;  %866 = vmatpush3.bf16.xpose.msra.mxu1 %v470_v23 }
 0x126   : > { %858 = vmatpush3.bf16.msra.mxu0 %v998_v17  ;;  %867 = vmatprep.subr.bf16.mxu1 %v1190_v18  ;;  %v1001_v24 = vld [vmem:[#allocation2] sm:$0xff]  }
 0x127   : > { %859 = vmatprep.subr.bf16.mxu0 %v1190_v18  ;;  %v467_v25 = vsel %vm462_vm3, %v1001_v24, 0  ;;  %v812_v26 = vld [vmem:[%s1580_s2] ss:$0 sm:$0xff] }
 0x12a   : > { %860 = vmatpush3.bf16.msra.mxu0 %v999_v19 }
 0x12d   : > { %862 = vmatmul.mubr.msk.bf16.vlgmr.msra.gmra.mxu0 %vm403_vm4, %v379_v22  ;;  %868 = vmatpush3.bf16.xpose.msra.mxu1 %v467_v25 }
 0x1ed   : > { %v441_v27 = vpop.f32.mrf.mxu0 }
 0x1ee   : > { %v442_v28 = vadd.f32 %v812_v26, %v441_v27 }
 0x1ef   : > { %v863_v29 = vpop.f32.mrf.mxu0 }
 0x1f0   : > { %v447_v30 = vpack.c.bf16 %v442_v28, %v442_v28 }
 0x1f1   : > { %v444_v31 = vpop.f32.mrf.mxu0 }
 0x1f2   : > { %546 = vrot.lane.b32.xlu1 %v447_v30, %s1192_s17  ;;  %870 = vmatmul.mubr.msk.bf16.vlgmr.msra.gmra.mxu1 %vm462_vm3, %v447_v30 }
 0x1f3   : > { %v864_v32 = vpop.f32.mrf.mxu0 }
 0x264   : > { %v547_v33 = vpop.permute.xlu1 %546 }
 0x265   : > { %v556_v34 = vsel %vm554_vm5, %v547_v33, 0  ;;  %879 = vmatprep.subr.msk.bf16.mxu0 %vm554_vm5, %v547_v33 }
 0x266   : > { %874 = vmatpush3.bf16.msra.mxu0 %v556_v34 }
 0x2b2   : > { %v506_v35 = vpop.f32.mrf.mxu1 }
 0x2b3   : > { %v512_v36 = vsel %vm403_vm4, %v506_v35, -inf }
 0x2b4   : > { %513 = vmax.xlane.f32.xlu0 %v512_v36  ;;  %v871_v37 = vpop.f32.mrf.mxu1 }
 0x2b6   : > { %v509_v38 = vpop.f32.mrf.mxu1 }
 0x2b8   : > { %v872_v39 = vpop.f32.mrf.mxu1 }
 0x33d   : > { %v514_v40 = vpop.xlane.xlu0 %513 }
 0x33e   : > { %v515_v41 = vsub.f32 %v506_v35, %v514_v40 }
 0x340   : > { %v516_v42 = vmul.f32 1.442695, %v515_v41 }
 0x342   : > { %1002 = vpow2.f32 %v516_v42 }
 0x34f   : > { %v1003_v43 = vpop.eup %1002 }
 0x350   : > { %v518_v44 = vsel %vm403_vm4, %v1003_v43, 0.0 }
 0x351   : > { %519 = vadd.xlane.f32.xlu0 %v518_v44 }
 0x367   : > { %618 = vrot.lane.b32.xlu0 %v442_v28, %s1192_s17 }
 0x3da   : > { %v520_v45 = vpop.xlane.xlu0 %519 }
 0x3db   : > { %1004 = vrcp.f32 %v520_v45 }
 0x3de   : > { %v619_v63 = vpop.permute.xlu0 %618 }
 0x3e8   : > { %v1005_v46 = vpop.eup %1004 }
 0x3e9   : > { %v522_v47 = vmul.f32 %v1005_v46, %v1003_v43 }
 0x3eb   : > { %v528_v48 = vpack.c.bf16 %v522_v47, %v522_v47  ;;  %523 = vst.msk [vmem:[%s1555_s10] sm:$0xff] %vm403_vm4, %v522_v47 }
 0x3ed   : > { %529 = vxpose.xlu1.c.b16.start.end [1/1] (short) (narrow) %v528_v48, 32 }
 0x44f   : > { %v537_v49 = vpop.trf.xlu1 }
 0x450   : > { %875 = vmatprep.mubr.msk.bf16.mxu0 %vm462_vm3, %v537_v49 }
 0x453   : > { %v538_v50 = vpop.trf.xlu1 }
 0x454   : > { %876 = vmatmul.mubr.msk.bf16.vlgmr.msra.gmra.mxu0 %vm462_vm3, %v538_v50 }
 0x514   : > { %v877_v52 = vpop.f32.mrf.mxu0 }
 0x515   : > { %v609_v54 = vadd.f32 %v877_v52, %v526_v51 }
 0x516   : > { %v592_v55 = vpop.f32.mrf.mxu0 }
 0x517   : > { %613 = vst.msk [vmem:[#allocation3 + $0x10] sm:$0xff] %vm403_vm4, %v609_v54  ;;  %v607_v57 = vadd.f32 %v592_v55, %v524_v53 }
 0x518   : > { %v878_v58 = vpop.f32.mrf.mxu0 }
 0x519   : > { %611 = vst.msk [vmem:[#allocation3] sm:$0xff] %vm403_vm4, %v607_v57  ;;  %v610_v60 = vadd.f32 %v878_v58, %v527_v56 }
 0x51a   : > { %v595_v61 = vpop.f32.mrf.mxu0 }
 0x51b   : > { %614 = vst.msk [vmem:[#allocation3 + $0x18] sm:$0xff] %vm403_vm4, %v610_v60  ;;  %v608_v62 = vadd.f32 %v595_v61, %v525_v59 }
 0x51d   : > { %612 = vst.msk [vmem:[#allocation3 + $0x8] sm:$0xff] %vm403_vm4, %v608_v62 }
 0x523   : > { %626 = sbr.rel (%p821_p9) target bundleno = 1329 (0x531), region = 48 }
 0x524   : > { %v616_v0 = vld [vmem:[%s615_s9] sm:$0xff] }
 0x525   : > { %v621_v1 = vadd.f32 %v619_v63, %v616_v0 }
 0x527   : > { %622 = vst.msk [vmem:[%s615_s9] sm:$0xff] %vm403_vm4, %v621_v1 }
 0x52e   : > { %v627_v2 = vld [vmem:[#allocation3] sm:$0xff]  ;;  %v628_v3 = vld [vmem:[#allocation3 + $0x8] sm:$0xff]  ;;  %v629_v4 = vld [vmem:[#allocation3 + $0x10] sm:$0xff] }
 0x52f   : > { %631 = vst.msk [vmem:[%s1388_s29] sm:$0xff] %vm403_vm4, %v627_v2  ;;  %632 = vst.msk [vmem:[%s1388_s29 + $0x8] sm:$0xff] %vm403_vm4, %v628_v3  ;;  %v630_v5 = vld [vmem:[#allocation3 + $0x18] sm:$0xff] }
 0x530   : > { %633 = vst.msk [vmem:[%s1388_s29 + $0x10] sm:$0xff] %vm403_vm4, %v629_v4  ;;  %634 = vst.msk [vmem:[%s1388_s29 + $0x18] sm:$0xff] %vm403_vm4, %v630_v5 }
 0x531 PF: > { %s835_s14 = sshll.u32 %s1172_s25, 9  ;;  %s654_s6 = sshll.u32 %s1388_s29, 4  ;;  %s1455_s6 = int_to_ptr.vmem [resolvable:$true] %s654_s6 }
 0x532   : > { %s1452_s11 = scalar_lea.hbm %s1545_s4, %s835_s14  ;;  %s636_s12 = scalar_lea.sflag [#allocation6], %s1373_s27 }
 0x533   : > { %s1034_s8 = scalar_lea.vmem %s1455_s6, 512  ;;  %s1193_s17 = smov [#allocation7]  }
 0x534   : > { %p1035_p4 = scmp.ne.s32.totalorder %s1455_s6, %s1034_s8  ;;  %s1038_s9 = sshll.u32 %s1193_s17, 4  ;;  %s1039_s9 = int_to_ptr.vmem [resolvable:$false] %s1038_s9 }
 0x535   : > { %s1040_s26 = scalar_lea.vmem %s1039_s9, 1024  ;;  %p1041_p12 = scmp.lt.s32.totalorder %s1455_s6, %s1039_s9 }
 0x536   : > { %p1036_p6 = pnand %p1035_p4, %p1315_p10  ;;  %p1042_p13 = scmp.lt.s32.totalorder %s1040_s26, %s1034_s8 }
 0x538   : > { %p1037_p7 = pneg %p1036_p6  ;;  %p1043_p0 = por %p1042_p13, %p1041_p12 }
 0x53a   : > { %p1044_p1 = pnand %p1043_p0, %p1037_p7 }
 0x53c   : > { %1047 = shalt.err (!%p1044_p1)
}
 0x53d   : > { %s1048_s29 = scalar_lea.hbm %s1452_s11, 512  ;;  %s1052_s16 = scalar_lea.hbm %s1545_s4, 1024 }
 0x53e   : > { %p1049_p3 = scmp.ne.s32.totalorder %s1452_s11, %s1048_s29  ;;  %p1053_p11 = scmp.lt.s32.totalorder %s1452_s11, %s1545_s4 }
 0x53f   : > { %p1054_p9 = scmp.lt.s32.totalorder %s1052_s16, %s1048_s29 }
 0x540   : > { %p1050_p5 = pnand %p1049_p3, %p1315_p10 }
 0x541   : > { %p1055_p4 = por %p1054_p9, %p1053_p11 }
 0x542   : > { %p1051_p8 = pneg %p1050_p5 }
 0x544   : > { %p1056_p6 = pnand %p1055_p4, %p1051_p8 }
 0x546   : > { %1059 = shalt.err (!%p1056_p6)
}
 0x547   : > { %s1194_s26 = smov 128   ;;  %s1195_s8 = smov 8  }
 0x548   : > { %882 = dma.vmem_to_hbm [thread:$0]  (%p1315_p10), %s1455_s6, 512, %s1452_s11, %s636_s12, %s1194_s26, %s1194_s26, %s1195_s8  }
 0x549   : > { %s826_s10 = sshll.u32 %s1172_s25, 2  ;;  %s1581_s9 = scalar_lea.vmem [#allocation8], %s1386_s30 }
 0x54a   : > { %s672_s29 = sshll.u32 %s1581_s9, 4  ;;  %s668_s14 = sadd.s32 %s1168_s24, %s826_s10  ;;  %s673_s29 = int_to_ptr.vmem [resolvable:$true] %s672_s29 }
 0x54b   : > { %s827_s23 = sshll.u32 %s668_s14, 7  ;;  %s1582_s1 = sand.u32 1, %s1148_s19  }
 0x54c   : > { %s670_s0 = scalar_lea.hbm %s1546_s5, %s827_s23  ;;  %s641_s2 = scalar_lea.sflag [#allocation9], %s1582_s1 }
 0x54d   : > { %s1060_s3 = scalar_lea.vmem %s673_s29, 128  ;;  %s1196_s13 = smov [#allocation8]  }
 0x54e   : > { %p1061_p7 = scmp.ne.s32.totalorder %s673_s29, %s1060_s3  ;;  %s1064_s27 = sshll.u32 %s1196_s13, 4  ;;  %s1065_s27 = int_to_ptr.vmem [resolvable:$false] %s1064_s27 }
 0x54f   : > { %s1066_s25 = scalar_lea.vmem %s1065_s27, 256  ;;  %p1067_p10 = scmp.lt.s32.totalorder %s673_s29, %s1065_s27 }
 0x550   : > { %p1062_p12 = pnand %p1061_p7, %p1342_p2  ;;  %p1068_p0 = scmp.lt.s32.totalorder %s1066_s25, %s1060_s3 }
 0x552   : > { %p1063_p13 = pneg %p1062_p12  ;;  %p1069_p1 = por %p1068_p0, %p1067_p10 }
 0x554   : > { %p1070_p3 = pnand %p1069_p1, %p1063_p13 }
 0x556   : > { %1073 = shalt.err (!%p1070_p3)
}
 0x557   : > { %s1074_s24 = scalar_lea.hbm %s670_s0, 128  ;;  %s1078_s11 = scalar_lea.hbm %s1546_s5, 1024 }
 0x558   : > { %p1075_p5 = scmp.ne.s32.totalorder %s670_s0, %s1074_s24  ;;  %p1079_p9 = scmp.lt.s32.totalorder %s670_s0, %s1546_s5 }
 0x559   : > { %p1080_p4 = scmp.lt.s32.totalorder %s1078_s11, %s1074_s24 }
 0x55a   : > { %p1076_p8 = pnand %p1075_p5, %p1342_p2 }
 0x55b   : > { %p1081_p6 = por %p1080_p4, %p1079_p9 }
 0x55c   : > { %p1077_p11 = pneg %p1076_p8 }
 0x55e   : > { %p1082_p7 = pnand %p1081_p6, %p1077_p11 }
 0x560   : > { %1085 = shalt.err (!%p1082_p7)
}
 0x561   : > { %883 = dma.vmem_to_hbm [thread:$0]  (%p1342_p2), %s673_s29, 128, %s670_s0, %s641_s2  }
 0x562 PF: > { %s1583_s3 = sld [smem:[#allocation13_spill]]  ;;  %p898_p12 = scmp.ge.s32.totalorder %s1184_s28, 2 }
 0x563   : > { %s1584_s26 = sld [smem:[#allocation19_spill]] }
 0x568   : > { %s684_s8 = sand.u32 1, %s1583_s3  }
 0x569   : > { %p1585_p13 = scmp.ne.s32.totalorder %s1584_s26, 0  ;;  %s685_s10 = scalar_lea.sflag [#allocation6], %s684_s8 }
 0x56b   : > { %p891_p10 = pnand %p898_p12, %p1585_p13 }
 0x56d   : > { %p892_p0 = pneg %p891_p10 }
 0x56f   : > { %1135 = dma.done.wait (%p892_p0), %s685_s10, 512  }
 0x570   : > { %1137 = vsyncadd (%p892_p0), %s685_s10, 4294966784  ;;  %s693_s9 = sand.u32 1, %s1144_s18   ;;  %p1586_p1 = scmp.ne.s32.totalorder %s1575_s15, 0 }
 0x571   : > { %s694_s7 = scalar_lea.sflag [#allocation9], %s693_s9 }
 0x572   : > { %p894_p3 = pnand %p898_p12, %p1586_p1 }
 0x574   : > { %p895_p5 = pneg %p894_p3 }
 0x576   : > { %1139 = dma.done.wait (%p895_p5), %s694_s7, 128  }
 0x577   : > { %1141 = vsyncadd (%p895_p5), %s694_s7, 4294967168  ;;  %s25_s28 = sadd.s32 1, %s1184_s28   ;;  %s1587_s0 = sld [smem:[#allocation14_spill]] }
 0x578   : > { %p22_p2 = scmp.ge.s32.totalorder %s25_s28, 10   ;;  %s1588_s23 = sld [smem:[#allocation20_spill]] }
 0x579   : > { %s1589_s24 = sld [smem:[#allocation15_spill]]  ;;  %s1593_s18 = smov %s1148_s19 }
 0x57a   : > { %s1590_s25 = sld [smem:[#allocation16_spill]]  ;;  %s1594_s19 = smov %s1152_s20 }
 0x57b   : > { %s1591_s26 = sld [smem:[#allocation17_spill]]  ;;  %s1595_s20 = smov %s1338_s21 }
 0x57c   : > { %s1592_s27 = sld [smem:[#allocation18_spill]]  ;;  %s1596_s21 = smov %s1160_s22 }
 0x57d   : > { %s1597_s22 = smov %s1587_s0  ;;  %24 = sbr.rel (!%p22_p2) target bundleno = 16 (0x10), region = 108 }
 0x582   :  { %699 = vsyncpa [#allocation5], 1 }
 0x583   :  { %701 = vsyncpa [#allocation5 + $0x1], 1 }
 0x584   :  { %702 = vsyncpa [#allocation6], 1 }
 0x585   :  { %704 = vsyncpa [#allocation6 + $0x1], 1 }
 0x586   :  { %705 = vsyncpa [#allocation9], 1 }
 0x587   :  { %707 = vsyncpa [#allocation9 + $0x1], 1 }

</bundles_post_ra>
